<compile_context>
chip_gen: v6e
topology: v6e:2x2x1
jax: 0.10.0
libtpu: 0.0.40
codegen_flags: <defaults>
</compile_context>

<pallas_src>
import math

import jax
import jax.numpy as jnp
from jax.experimental import pallas as pl
from jax.experimental.pallas import tpu as pltpu

H1, H2, H3 = 400, 300, 100
H1P, H2P, H3P = 512, 384, 128          # lane-aligned padded hidden widths


def _round_up(n, m):
    return ((n + m - 1) // m) * m


def osi_kernel(x_ref, w1_ref, b1_ref, w2_ref, b2_ref, w3_ref, b3_ref,
               w4_ref, b4_ref, o_ref):
    # fc1..fc3: bf16 MXU matmuls, f32 accumulation, bias-add + tanh in f32.
    h = jnp.tanh(jnp.dot(x_ref[...], w1_ref[...],
                         preferred_element_type=jnp.float32) + b1_ref[...])
    h = jnp.tanh(jnp.dot(h.astype(jnp.bfloat16), w2_ref[...],
                         preferred_element_type=jnp.float32) + b2_ref[...])
    h = jnp.tanh(jnp.dot(h.astype(jnp.bfloat16), w3_ref[...],
                         preferred_element_type=jnp.float32) + b3_ref[...])
    # fc4 (no activation)
    out = jnp.dot(h.astype(jnp.bfloat16), w4_ref[...],
                  preferred_element_type=jnp.float32) + b4_ref[...]
    o_ref[...] = out.astype(o_ref.dtype)


def _pad2(a, rows, cols):
    return jnp.pad(a, ((0, rows - a.shape[0]), (0, cols - a.shape[1])))


def osi_forward(x, params):
    """x: (B, input_shape) f32 -> (B, output_shape) f32."""
    w1, b1, w2, b2, w3, b3, w4, b4 = (
        params[k] for k in ("w1", "b1", "w2", "b2", "w3", "b3", "w4", "b4"))
    B, in_dim = x.shape
    out_dim = w4.shape[0]

    in_pad = _round_up(in_dim, 128)
    out_pad = _round_up(out_dim, 128)

    # Batch tiling: at least one full sublane group (8 rows).  Large batches
    # use 256-row tiles so per-grid-step overhead is amortized while x/out
    # DMAs still pipeline across steps; small batches run as a single tile.
    tm = 256 if B >= 256 else _round_up(B, 8)
    b_pad = _round_up(B, tm)
    n_tiles = b_pad // tm

    # Glue: transpose weights to (in, out), zero-pad to lane-aligned shapes,
    # cast matmul operands to bf16 (zeros stay exact under the cast).
    xp = _pad2(x, b_pad, in_pad).astype(jnp.bfloat16)
    w1p = _pad2(w1.T, in_pad, H1P).astype(jnp.bfloat16)
    w2p = _pad2(w2.T, H1P, H2P).astype(jnp.bfloat16)
    w3p = _pad2(w3.T, H2P, H3P).astype(jnp.bfloat16)
    w4p = _pad2(w4.T, H3P, out_pad).astype(jnp.bfloat16)
    b1p = jnp.pad(b1, (0, H1P - H1)).reshape(1, H1P).astype(jnp.float32)
    b2p = jnp.pad(b2, (0, H2P - H2)).reshape(1, H2P).astype(jnp.float32)
    b3p = jnp.pad(b3, (0, H3P - H3)).reshape(1, H3P).astype(jnp.float32)
    b4p = jnp.pad(b4, (0, out_pad - out_dim)).reshape(1, out_pad).astype(jnp.float32)

    # Weights/biases: full block, constant index map -> DMA'd once, VMEM
    # resident across batch-grid steps.
    const2d = lambda arr: pl.BlockSpec(arr.shape, lambda i: (0, 0))

    out = pl.pallas_call(
        osi_kernel,
        out_shape=jax.ShapeDtypeStruct((b_pad, out_pad), jnp.float32),
        grid=(n_tiles,),
        in_specs=[
            pl.BlockSpec((tm, in_pad), lambda i: (i, 0)),
            const2d(w1p), const2d(b1p),
            const2d(w2p), const2d(b2p),
            const2d(w3p), const2d(b3p),
            const2d(w4p), const2d(b4p),
        ],
        out_specs=pl.BlockSpec((tm, out_pad), lambda i: (i, 0)),
        compiler_params=pltpu.CompilerParams(
            dimension_semantics=("parallel",)),   # shards batch across TCs on v7x
    )(xp, w1p, b1p, w2p, b2p, w3p, b3p, w4p, b4p)

    return out[:B, :out_dim]


def init_params(key, input_shape, output_shape, init_w=0.003):
    """Mirror OsiModel.init_weights; biases keep PyTorch's default Linear init
    U(-1/sqrt(fan_in), 1/sqrt(fan_in)) since init_weights only touches .weight."""
    ks = jax.random.split(key, 8)

    def u(k, shape, bound):
        return jax.random.uniform(k, shape, jnp.float32, -bound, bound)

    return {
        "w1": u(ks[0], (H1, input_shape), 1.0 / math.sqrt(input_shape)),
        "b1": u(ks[1], (H1,), 1.0 / math.sqrt(input_shape)),
        "w2": u(ks[2], (H2, H1), 1.0 / math.sqrt(H1)),
        "b2": u(ks[3], (H2,), 1.0 / math.sqrt(H1)),
        "w3": u(ks[4], (H3, H2), 1.0 / math.sqrt(H2)),
        "b3": u(ks[5], (H3,), 1.0 / math.sqrt(H2)),
        "w4": u(ks[6], (output_shape, H3), init_w),
        "b4": u(ks[7], (output_shape,), 1.0 / math.sqrt(H3)),
    }


def osi_ref(x, params):
    """Pure-JAX f32 reference of the PyTorch forward."""
    h = jnp.tanh(x @ params["w1"].T + params["b1"])
    h = jnp.tanh(h @ params["w2"].T + params["b2"])
    h = jnp.tanh(h @ params["w3"].T + params["b3"])
    return h @ params["w4"].T + params["b4"]


if __name__ == "__main__":
    key = jax.random.PRNGKey(0)
    k_p, k_x, k_x2 = jax.random.split(key, 3)

    input_shape = 16
    output_shape = 8

    params = init_params(k_p, input_shape, output_shape)

    # Small inference-style batch (padded to 8 rows, single tile).
    x_small = jax.random.normal(k_x, (2, input_shape), jnp.float32)
    out_small = jax.block_until_ready(osi_forward(x_small, params))
    ref_small = osi_ref(x_small, params)
    assert out_small.shape == (2, output_shape)
    assert jnp.allclose(out_small, ref_small, atol=2e-3, rtol=2e-2), (out_small, ref_small)

    # Training-style batch exercising the tiled parallel batch grid (2 tiles).
    x_big = jax.random.normal(k_x2, (512, input_shape), jnp.float32)
    out_big = jax.block_until_ready(osi_forward(x_big, params))
    ref_big = osi_ref(x_big, params)
    assert out_big.shape == (512, output_shape)
    assert jnp.allclose(out_big, ref_big, atol=2e-3, rtol=2e-2), (out_big, ref_big)

    print("KERNEL_OK")
</pallas_src>

<mosaic_0001>
module attributes {stable_mosaic.version = 11 : i64} {
  func.func @osi_kernel(%arg0: i32, %arg1: memref<8x128xbf16, #tpu.memory_space<vmem>>, %arg2: memref<128x512xbf16, #tpu.memory_space<vmem>>, %arg3: memref<1x512xf32, #tpu.memory_space<vmem>>, %arg4: memref<512x384xbf16, #tpu.memory_space<vmem>>, %arg5: memref<1x384xf32, #tpu.memory_space<vmem>>, %arg6: memref<384x128xbf16, #tpu.memory_space<vmem>>, %arg7: memref<1x128xf32, #tpu.memory_space<vmem>>, %arg8: memref<128x128xbf16, #tpu.memory_space<vmem>>, %arg9: memref<1x128xf32, #tpu.memory_space<vmem>>, %arg10: memref<8x128xf32, #tpu.memory_space<vmem>>) attributes {dimension_semantics = [#tpu.dimension_semantics<parallel>], iteration_bounds = array<i64: 1>, scalar_prefetch = 0 : i64, scratch_operands = 0 : i64, tpu.core_type = #tpu.core_type<tc>, window_params = [{transform_indices = @transform_0, window_bounds = array<i64: 8, 128>}, {pipeline_mode = #tpu.pipeline_mode<synchronous>, transform_indices = @transform_1, window_bounds = array<i64: 128, 512>}, {pipeline_mode = #tpu.pipeline_mode<synchronous>, transform_indices = @transform_2, window_bounds = array<i64: 1, 512>}, {pipeline_mode = #tpu.pipeline_mode<synchronous>, transform_indices = @transform_3, window_bounds = array<i64: 512, 384>}, {pipeline_mode = #tpu.pipeline_mode<synchronous>, transform_indices = @transform_4, window_bounds = array<i64: 1, 384>}, {pipeline_mode = #tpu.pipeline_mode<synchronous>, transform_indices = @transform_5, window_bounds = array<i64: 384, 128>}, {pipeline_mode = #tpu.pipeline_mode<synchronous>, transform_indices = @transform_6, window_bounds = array<i64: 1, 128>}, {pipeline_mode = #tpu.pipeline_mode<synchronous>, transform_indices = @transform_7, window_bounds = array<i64: 128, 128>}, {pipeline_mode = #tpu.pipeline_mode<synchronous>, transform_indices = @transform_8, window_bounds = array<i64: 1, 128>}, {transform_indices = @transform_9, window_bounds = array<i64: 8, 128>}]} {
    %c0 = arith.constant 0 : index
    %c0_0 = arith.constant 0 : index
    %0 = vector.load %arg1[%c0, %c0_0] : memref<8x128xbf16, #tpu.memory_space<vmem>>, vector<8x128xbf16>
    %c0_1 = arith.constant 0 : index
    %c0_2 = arith.constant 0 : index
    %1 = vector.load %arg2[%c0_1, %c0_2] : memref<128x512xbf16, #tpu.memory_space<vmem>>, vector<128x512xbf16>
    %cst = arith.constant dense<0.000000e+00> : vector<8x512xf32>
    %2 = tpu.matmul %0, %1, %cst {dimension_numbers = #tpu.dot_dimension_numbers<[1], [0], [0], [1], [0, 0, 1, 1], [], []>} : vector<8x128xbf16>, vector<128x512xbf16>, vector<8x512xf32> -> vector<8x512xf32>
    %c0_3 = arith.constant 0 : index
    %c0_4 = arith.constant 0 : index
    %3 = vector.load %arg3[%c0_3, %c0_4] : memref<1x512xf32, #tpu.memory_space<vmem>>, vector<1x512xf32>
    %4 = vector.broadcast %3 : vector<1x512xf32> to vector<8x512xf32>
    %5 = arith.addf %2, %4 : vector<8x512xf32>
    %6 = math.tanh %5 : vector<8x512xf32>
    %7 = arith.truncf %6 : vector<8x512xf32> to vector<8x512xbf16>
    %c0_5 = arith.constant 0 : index
    %c0_6 = arith.constant 0 : index
    %8 = vector.load %arg4[%c0_5, %c0_6] : memref<512x384xbf16, #tpu.memory_space<vmem>>, vector<512x384xbf16>
    %cst_7 = arith.constant dense<0.000000e+00> : vector<8x384xf32>
    %9 = tpu.matmul %7, %8, %cst_7 {dimension_numbers = #tpu.dot_dimension_numbers<[1], [0], [0], [1], [0, 0, 1, 1], [], []>} : vector<8x512xbf16>, vector<512x384xbf16>, vector<8x384xf32> -> vector<8x384xf32>
    %c0_8 = arith.constant 0 : index
    %c0_9 = arith.constant 0 : index
    %10 = vector.load %arg5[%c0_8, %c0_9] : memref<1x384xf32, #tpu.memory_space<vmem>>, vector<1x384xf32>
    %11 = vector.broadcast %10 : vector<1x384xf32> to vector<8x384xf32>
    %12 = arith.addf %9, %11 : vector<8x384xf32>
    %13 = math.tanh %12 : vector<8x384xf32>
    %14 = arith.truncf %13 : vector<8x384xf32> to vector<8x384xbf16>
    %c0_10 = arith.constant 0 : index
    %c0_11 = arith.constant 0 : index
    %15 = vector.load %arg6[%c0_10, %c0_11] : memref<384x128xbf16, #tpu.memory_space<vmem>>, vector<384x128xbf16>
    %cst_12 = arith.constant dense<0.000000e+00> : vector<8x128xf32>
    %16 = tpu.matmul %14, %15, %cst_12 {dimension_numbers = #tpu.dot_dimension_numbers<[1], [0], [0], [1], [0, 0, 1, 1], [], []>} : vector<8x384xbf16>, vector<384x128xbf16>, vector<8x128xf32> -> vector<8x128xf32>
    %c0_13 = arith.constant 0 : index
    %c0_14 = arith.constant 0 : index
    %17 = vector.load %arg7[%c0_13, %c0_14] : memref<1x128xf32, #tpu.memory_space<vmem>>, vector<1x128xf32>
    %18 = vector.broadcast %17 : vector<1x128xf32> to vector<8x128xf32>
    %19 = arith.addf %16, %18 : vector<8x128xf32>
    %20 = math.tanh %19 : vector<8x128xf32>
    %21 = arith.truncf %20 : vector<8x128xf32> to vector<8x128xbf16>
    %c0_15 = arith.constant 0 : index
    %c0_16 = arith.constant 0 : index
    %22 = vector.load %arg8[%c0_15, %c0_16] : memref<128x128xbf16, #tpu.memory_space<vmem>>, vector<128x128xbf16>
    %cst_17 = arith.constant dense<0.000000e+00> : vector<8x128xf32>
    %23 = tpu.matmul %21, %22, %cst_17 {dimension_numbers = #tpu.dot_dimension_numbers<[1], [0], [0], [1], [0, 0, 1, 1], [], []>} : vector<8x128xbf16>, vector<128x128xbf16>, vector<8x128xf32> -> vector<8x128xf32>
    %c0_18 = arith.constant 0 : index
    %c0_19 = arith.constant 0 : index
    %24 = vector.load %arg9[%c0_18, %c0_19] : memref<1x128xf32, #tpu.memory_space<vmem>>, vector<1x128xf32>
    %25 = vector.broadcast %24 : vector<1x128xf32> to vector<8x128xf32>
    %26 = arith.addf %23, %25 : vector<8x128xf32>
    %c0_20 = arith.constant 0 : index
    %c0_21 = arith.constant 0 : index
    %27 = vector.load %arg10[%c0_20, %c0_21] : memref<8x128xf32, #tpu.memory_space<vmem>>, vector<8x128xf32>
    tpu.vector_store %arg10[%c0_20, %c0_21], %26 {strides = array<i32>} : memref<8x128xf32, #tpu.memory_space<vmem>>, vector<8x128xf32>,
    return
  }
  func.func @transform_0(%arg0: i32) -> (i32, i32) {
    %c0_i32 = arith.constant 0 : i32
    %c0_i32_0 = arith.constant 0 : i32
    return %arg0, %c0_i32 : i32, i32
  }
  func.func @transform_1(%arg0: i32) -> (i32, i32) {
    %c0_i32 = arith.constant 0 : i32
    %c0_i32_0 = arith.constant 0 : i32
    %c0_i32_1 = arith.constant 0 : i32
    return %c0_i32, %c0_i32_0 : i32, i32
  }
  func.func @transform_2(%arg0: i32) -> (i32, i32) {
    %c0_i32 = arith.constant 0 : i32
    %c0_i32_0 = arith.constant 0 : i32
    %c0_i32_1 = arith.constant 0 : i32
    return %c0_i32, %c0_i32_0 : i32, i32
  }
  func.func @transform_3(%arg0: i32) -> (i32, i32) {
    %c0_i32 = arith.constant 0 : i32
    %c0_i32_0 = arith.constant 0 : i32
    %c0_i32_1 = arith.constant 0 : i32
    return %c0_i32, %c0_i32_0 : i32, i32
  }
  func.func @transform_4(%arg0: i32) -> (i32, i32) {
    %c0_i32 = arith.constant 0 : i32
    %c0_i32_0 = arith.constant 0 : i32
    %c0_i32_1 = arith.constant 0 : i32
    return %c0_i32, %c0_i32_0 : i32, i32
  }
  func.func @transform_5(%arg0: i32) -> (i32, i32) {
    %c0_i32 = arith.constant 0 : i32
    %c0_i32_0 = arith.constant 0 : i32
    %c0_i32_1 = arith.constant 0 : i32
    return %c0_i32, %c0_i32_0 : i32, i32
  }
  func.func @transform_6(%arg0: i32) -> (i32, i32) {
    %c0_i32 = arith.constant 0 : i32
    %c0_i32_0 = arith.constant 0 : i32
    %c0_i32_1 = arith.constant 0 : i32
    return %c0_i32, %c0_i32_0 : i32, i32
  }
  func.func @transform_7(%arg0: i32) -> (i32, i32) {
    %c0_i32 = arith.constant 0 : i32
    %c0_i32_0 = arith.constant 0 : i32
    %c0_i32_1 = arith.constant 0 : i32
    return %c0_i32, %c0_i32_0 : i32, i32
  }
  func.func @transform_8(%arg0: i32) -> (i32, i32) {
    %c0_i32 = arith.constant 0 : i32
    %c0_i32_0 = arith.constant 0 : i32
    %c0_i32_1 = arith.constant 0 : i32
    return %c0_i32, %c0_i32_0 : i32, i32
  }
  func.func @transform_9(%arg0: i32) -> (i32, i32) {
    %c0_i32 = arith.constant 0 : i32
    %c0_i32_0 = arith.constant 0 : i32
    return %arg0, %c0_i32 : i32, i32
  }
}

</mosaic_0001>

<bundles_post_ra>
// kernel: tpu_custom_call.1
= control target key start
LH: loop header
LB: loop body
LE: loop exit
PB: predicated region body
PF: predicated region fallthrough
CT: control target
= control target key end

     0   :  { %14 = vsyncpa [#allocation3], 0  ;;  %s2471_s0 = inlined_call_operand.hbm [shape: bf16[8,128], index: 0, kind: input, shape index: {}]   ;;  %s2472_s1 = inlined_call_operand.hbm [shape: bf16[128,512], index: 1, kind: input, shape index: {}]   ;;  %s2473_s2 = inlined_call_operand.hbm [shape: f32[1,512], index: 2, kind: input, shape index: {}]   ;;  %s2474_s3 = inlined_call_operand.hbm [shape: bf16[512,384], index: 3, kind: input, shape index: {}]   ;;  %s2475_s4 = inlined_call_operand.vmem [shape: f32[1,384], index: 4, kind: input, shape index: {}]   ;;  %s2476_s5 = inlined_call_operand.hbm [shape: bf16[384,128], index: 5, kind: input, shape index: {}]   ;;  %s2477_s6 = inlined_call_operand.vmem [shape: f32[1,128], index: 6, kind: input, shape index: {}]   ;;  %s2478_s7 = inlined_call_operand.hbm [shape: bf16[128,128], index: 7, kind: input, shape index: {}]   ;;  %s2479_s8 = inlined_call_operand.vmem [shape: f32[1,128], index: 8, kind: input, shape index: {}]   ;;  %s2480_s9 = inlined_call_operand.hbm [shape: f32[8,128], index: 9, kind: output, shape index: {}]  }
   0x1   :  { %15 = vsyncpa [#allocation6], 0 }
   0x2   :  { %16 = vsyncpa [#allocation9], 0 }
   0x3   :  { %17 = vsyncpa [#allocation12], 0 }
   0x4   :  { %18 = vsyncpa [#allocation4], 0  ;;  %s2329_s30 = smov [#allocation5]  }
   0x5   :  { %s34_s10 = sshll.u32 %s2329_s30, 4  ;;  %s35_s10 = int_to_ptr.vmem [resolvable:$true] %s34_s10 }
   0x6   :  { %s2187_s11 = scalar_lea.vmem %s35_s10, 4096  ;;  %p2192_p1 = scmp.lt.s32.totalorder %s35_s10, %s35_s10 }
   0x7   :  { %p2188_p0 = scmp.ne.s32.totalorder %s35_s10, %s2187_s11  ;;  %p2193_p2 = scmp.lt.s32.totalorder %s2187_s11, %s2187_s11 }
   0x9   :  { %p2194_p3 = por %p2193_p2, %p2192_p1 }
   0xb   :  { %p2195_p4 = pnand %p2194_p3, %p2188_p0 }
   0xd   :  { %2198 = shalt.err (!%p2195_p4)
}
   0xe   :  { %s2330_s12 = smov 256   ;;  %s2331_s13 = smov 16  }
   0xf   :  { %40 = dma.hbm_to_vmem [thread:$0]  %s2472_s1, 4096, %s35_s10, [#allocation6], %s2330_s12, %s2330_s12, %s2331_s13  }
  0x10   :  { %s2332_s16 = smov [#allocation8]  }
  0x11   :  { %s56_s17 = sshll.u32 %s2332_s16, 4  ;;  %s57_s17 = int_to_ptr.vmem [resolvable:$true] %s56_s17 }
  0x12   :  { %s2207_s18 = scalar_lea.vmem %s57_s17, 12288  ;;  %p2212_p6 = scmp.lt.s32.totalorder %s57_s17, %s57_s17 }
  0x13   :  { %p2208_p5 = scmp.ne.s32.totalorder %s57_s17, %s2207_s18  ;;  %p2213_p7 = scmp.lt.s32.totalorder %s2207_s18, %s2207_s18 }
  0x15   :  { %p2214_p8 = por %p2213_p7, %p2212_p6 }
  0x17   :  { %p2215_p9 = pnand %p2214_p8, %p2208_p5 }
  0x19   :  { %2218 = shalt.err (!%p2215_p9)
}
  0x1a   :  { %s2333_s19 = smov 192   ;;  %s2334_s20 = smov 12  }
  0x1b   :  { %62 = dma.hbm_to_vmem [thread:$0]  %s2474_s3, 12288, %s57_s17, [#allocation9], %s2333_s19, %s2333_s19, %s2334_s20  }
  0x1c   :  { %s2335_s23 = smov [#allocation2]   ;;  %s2336_s25 = smov [#allocation7]  }
  0x1d   :  { %s25_s24 = sshll.u32 %s2335_s23, 4  ;;  %s47_s1 = sshll.u32 %s2336_s25, 4  ;;  %s26_s24 = int_to_ptr.vmem [resolvable:$true] %s25_s24  ;;  %s48_s1 = int_to_ptr.vmem [resolvable:$true] %s47_s1 }
  0x1e   :  { %s2227_s26 = scalar_lea.vmem %s26_s24, 64  ;;  %p2232_p11 = scmp.lt.s32.totalorder %s26_s24, %s26_s24 }
  0x1f   :  { %p2228_p10 = scmp.ne.s32.totalorder %s26_s24, %s2227_s26  ;;  %p2233_p12 = scmp.lt.s32.totalorder %s2227_s26, %s2227_s26 }
  0x21   :  { %p2234_p13 = por %p2233_p12, %p2232_p11 }
  0x23   :  { %p2235_p0 = pnand %p2234_p13, %p2228_p10 }
  0x25   :  { %2238 = shalt.err (!%p2235_p0)
}
  0x26   :  { %28 = dma.hbm_to_vmem [thread:$0]  %s2471_s0, 64, %s26_s24, [#allocation3]  }
  0x27   :  { %s2247_s29 = scalar_lea.vmem %s48_s1, 64  ;;  %p2252_p2 = scmp.lt.s32.totalorder %s48_s1, %s48_s1 }
  0x28   :  { %p2248_p1 = scmp.ne.s32.totalorder %s48_s1, %s2247_s29  ;;  %p2253_p3 = scmp.lt.s32.totalorder %s2247_s29, %s2247_s29 }
  0x2a   :  { %p2254_p4 = por %p2253_p3, %p2252_p2 }
  0x2c   :  { %p2255_p5 = pnand %p2254_p4, %p2248_p1 }
  0x2e   :  { %2258 = shalt.err (!%p2255_p5)
}
  0x2f   :  { %50 = dma.hbm_to_vmem [thread:$0]  %s2473_s2, 64, %s48_s1, [#allocation6]  }
  0x30   :  { %s2337_s10 = smov [#allocation10]  }
  0x31   :  { %s70_s11 = sshll.u32 %s2337_s10, 4  ;;  %s71_s11 = int_to_ptr.vmem [resolvable:$true] %s70_s11 }
  0x32   :  { %s2267_s12 = scalar_lea.vmem %s71_s11, 3072  ;;  %p2272_p7 = scmp.lt.s32.totalorder %s71_s11, %s71_s11 }
  0x33   :  { %p2268_p6 = scmp.ne.s32.totalorder %s71_s11, %s2267_s12  ;;  %p2273_p8 = scmp.lt.s32.totalorder %s2267_s12, %s2267_s12 }
  0x35   :  { %p2274_p9 = por %p2273_p8, %p2272_p7 }
  0x37   :  { %p2275_p10 = pnand %p2274_p9, %p2268_p6 }
  0x39   :  { %2278 = shalt.err (!%p2275_p10)
}
  0x3a   :  { %s2338_s0 = smov 64   ;;  %s2339_s13 = smov 4  }
  0x3b   :  { %76 = dma.hbm_to_vmem [thread:$0]  %s2476_s5, 3072, %s71_s11, [#allocation9], %s2338_s0, %s2338_s0, %s2339_s13  }
  0x3c   :  { %s2340_s16 = smov [#allocation11]  }
  0x3d   :  { %s84_s17 = sshll.u32 %s2340_s16, 4  ;;  %s85_s17 = int_to_ptr.vmem [resolvable:$true] %s84_s17 }
  0x3e   :  { %s2287_s2 = scalar_lea.vmem %s85_s17, 1024  ;;  %p2292_p12 = scmp.lt.s32.totalorder %s85_s17, %s85_s17 }
  0x3f   :  { %p2288_p11 = scmp.ne.s32.totalorder %s85_s17, %s2287_s2  ;;  %p2293_p13 = scmp.lt.s32.totalorder %s2287_s2, %s2287_s2 }
  0x41   :  { %p2294_p0 = por %p2293_p13, %p2292_p12 }
  0x43   :  { %p2295_p1 = pnand %p2294_p0, %p2288_p11 }
  0x45   :  { %2298 = shalt.err (!%p2295_p1)
}
  0x46   :  { %90 = dma.hbm_to_vmem [thread:$0]  %s2478_s7, 1024, %s85_s17, [#allocation12], %s2338_s0, %s2338_s0, %s2339_s13  }
  0x47   :  { %2319 = dma.done.wait [#allocation3], 64  }
  0x48   :  { %2320 = vsyncadd [#allocation3], 4294967232 }
  0x49   :  { %2321 = dma.done.wait [#allocation6], 4160  }
  0x4a   :  { %2322 = vsyncadd [#allocation6], 4294963136 }
  0x4b   :  { %2323 = dma.done.wait [#allocation9], 15360  }
  0x4c   :  { %2324 = vsyncadd [#allocation9], 4294951936 }
  0x4d   :  { %2325 = dma.done.wait [#allocation12], 1024  }
  0x4e   :  { %2326 = vsyncadd [#allocation12], 4294966272  ;;  %v2341_v0 = vmov 0   ;;  %v1955_v1 = vld [vmem:[#allocation5 + $0xe4] ss:$16 sps:$4 sm:$0xff]   ;;  %vm2343_vm0 = vmmov 0  }
  0x4f   :  { %359 = vmatprep.mubr.bf16.mxu0 %v2341_v0  ;;  %400 = vmatprep.mubr.bf16.mxu1 %v2341_v0  ;;  %v1957_v2 = vld [vmem:[#allocation5 + $0xec] ss:$16 sps:$4 sm:$0xff]   ;;  %v1959_v3 = vld [vmem:[#allocation5 + $0xe0] ss:$16 sps:$4 sm:$0xff]   ;;  %v1960_v4 = vld [vmem:[#allocation5 + $0xe8] ss:$16 sps:$4 sm:$0xff]  }
  0x50   :  { %327 = vmatprep.subr.bf16.mxu0 %v1955_v1  ;;  %368 = vmatprep.subr.bf16.mxu1 %v1957_v2  ;;  %v1961_v5 = vld [vmem:[#allocation5 + $0xc4] ss:$16 sps:$4 sm:$0xff]   ;;  %v1963_v6 = vld [vmem:[#allocation5 + $0xcc] ss:$16 sps:$4 sm:$0xff]   ;;  %v1965_v7 = vld [vmem:[#allocation5 + $0xc0] ss:$16 sps:$4 sm:$0xff]  }
  0x51   :  { %328 = vmatpush1.bf16.msra.mxu0 %v1959_v3  ;;  %369 = vmatpush1.bf16.msra.mxu1 %v1960_v4  ;;  %v1966_v8 = vld [vmem:[#allocation5 + $0xc8] ss:$16 sps:$4 sm:$0xff]   ;;  %v1967_v9 = vld [vmem:[#allocation5 + $0xa4] ss:$16 sps:$4 sm:$0xff]   ;;  %v1969_v10 = vld [vmem:[#allocation5 + $0xac] ss:$16 sps:$4 sm:$0xff]  }
  0x52   :  { %329 = vmatprep.subr.bf16.mxu0 %v1961_v5  ;;  %370 = vmatprep.subr.bf16.mxu1 %v1963_v6  ;;  %v1971_v11 = vld [vmem:[#allocation5 + $0xa0] ss:$16 sps:$4 sm:$0xff]   ;;  %v1972_v12 = vld [vmem:[#allocation5 + $0xa8] ss:$16 sps:$4 sm:$0xff]   ;;  %v1973_v13 = vld [vmem:[#allocation5 + $0x84] ss:$16 sps:$4 sm:$0xff]  }
  0x53   :  { %v1975_v14 = vld [vmem:[#allocation5 + $0x8c] ss:$16 sps:$4 sm:$0xff]   ;;  %v1977_v15 = vld [vmem:[#allocation5 + $0x80] ss:$16 sps:$4 sm:$0xff]   ;;  %v1978_v16 = vld [vmem:[#allocation5 + $0x88] ss:$16 sps:$4 sm:$0xff]  }
  0x54   :  { %v1979_v17 = vld [vmem:[#allocation5 + $0x64] ss:$16 sps:$4 sm:$0xff]   ;;  %v1981_v18 = vld [vmem:[#allocation5 + $0x6c] ss:$16 sps:$4 sm:$0xff]   ;;  %v1983_v19 = vld [vmem:[#allocation5 + $0x60] ss:$16 sps:$4 sm:$0xff]  }
  0x55   :  { %330 = vmatpush1.bf16.msra.mxu0 %v1965_v7  ;;  %371 = vmatpush1.bf16.msra.mxu1 %v1966_v8  ;;  %v1984_v20 = vld [vmem:[#allocation5 + $0x68] ss:$16 sps:$4 sm:$0xff]   ;;  %v1985_v21 = vld [vmem:[#allocation5 + $0x44] ss:$16 sps:$4 sm:$0xff]   ;;  %v1987_v22 = vld [vmem:[#allocation5 + $0x4c] ss:$16 sps:$4 sm:$0xff]  }
  0x56   :  { %331 = vmatprep.subr.bf16.mxu0 %v1967_v9  ;;  %372 = vmatprep.subr.bf16.mxu1 %v1969_v10  ;;  %v1989_v23 = vld [vmem:[#allocation5 + $0x40] ss:$16 sps:$4 sm:$0xff]   ;;  %v1990_v24 = vld [vmem:[#allocation5 + $0x48] ss:$16 sps:$4 sm:$0xff]   ;;  %v1991_v25 = vld [vmem:[#allocation5 + $0x24] ss:$16 sps:$4 sm:$0xff]  }
  0x57   :  { %v1993_v26 = vld [vmem:[#allocation5 + $0x2c] ss:$16 sps:$4 sm:$0xff]   ;;  %v1995_v27 = vld [vmem:[#allocation5 + $0x20] ss:$16 sps:$4 sm:$0xff]   ;;  %v1996_v28 = vld [vmem:[#allocation5 + $0x28] ss:$16 sps:$4 sm:$0xff]  }
  0x58   :  { %v1997_v29 = vld [vmem:[#allocation5 + $0x4] ss:$16 sps:$4 sm:$0xff]   ;;  %v1999_v30 = vld [vmem:[#allocation5 + $0xc] ss:$16 sps:$4 sm:$0xff]   ;;  %v2001_v31 = vld [vmem:[#allocation5] ss:$16 sps:$4 sm:$0xff]  }
  0x59   :  { %332 = vmatpush1.bf16.msra.mxu0 %v1971_v11  ;;  %373 = vmatpush1.bf16.msra.mxu1 %v1972_v12  ;;  %v2002_v32 = vld [vmem:[#allocation5 + $0x8] ss:$16 sps:$4 sm:$0xff]   ;;  %v2005_v33 = vld [vmem:[#allocation8 + $0xac] ss:$12 sps:$4 sm:$0xff]   ;;  %v2009_v40 = vld [vmem:[#allocation8 + $0x90] ss:$12 sps:$4 sm:$0xff]  }
  0x5a   :  { %333 = vmatprep.subr.bf16.mxu0 %v1973_v13  ;;  %374 = vmatprep.subr.bf16.mxu1 %v1975_v14  ;;  %v2008_v34 = vld [vmem:[#allocation8 + $0x22c] ss:$12 sps:$4 sm:$0xff]   ;;  %v2003_v36 = vld [vmem:[#allocation8 + $0xa8] ss:$12 sps:$4 sm:$0xff]   ;;  %v2012_v41 = vld [vmem:[#allocation8 + $0x210] ss:$12 sps:$4 sm:$0xff]  }
  0x5b   :  { %v112_v35 = vld [vmem:[#allocation2] sm:$0xf]  ;;  %v2006_v37 = vld [vmem:[#allocation8 + $0x228] ss:$12 sps:$4 sm:$0xff]   ;;  %v2023_v46 = vld [vmem:[#allocation8 + $0x64] ss:$12 sps:$4 sm:$0xff]  }
  0x5c   :  { %v2011_v38 = vld [vmem:[#allocation8 + $0x94] ss:$12 sps:$4 sm:$0xff]   ;;  %v2017_v42 = vld [vmem:[#allocation8 + $0x7c] ss:$12 sps:$4 sm:$0xff]   ;;  %v2015_v44 = vld [vmem:[#allocation8 + $0x78] ss:$12 sps:$4 sm:$0xff]  }
  0x5d   :  { %334 = vmatpush1.bf16.msra.mxu0 %v1977_v15  ;;  %375 = vmatpush1.bf16.msra.mxu1 %v1978_v16  ;;  %v2014_v39 = vld [vmem:[#allocation8 + $0x214] ss:$12 sps:$4 sm:$0xff]   ;;  %v2020_v43 = vld [vmem:[#allocation8 + $0x1fc] ss:$12 sps:$4 sm:$0xff]   ;;  %v2018_v45 = vld [vmem:[#allocation8 + $0x1f8] ss:$12 sps:$4 sm:$0xff]  }
  0x5e   :  { %335 = vmatprep.subr.bf16.mxu0 %v1979_v17  ;;  %376 = vmatprep.subr.bf16.mxu1 %v1981_v18  ;;  %v2026_v47 = vld [vmem:[#allocation8 + $0x1e4] ss:$12 sps:$4 sm:$0xff]   ;;  %v2021_v48 = vld [vmem:[#allocation8 + $0x60] ss:$12 sps:$4 sm:$0xff]   ;;  %v2027_v52 = vld [vmem:[#allocation8 + $0x48] ss:$12 sps:$4 sm:$0xff]  }
  0x5f   :  { %v2024_v49 = vld [vmem:[#allocation8 + $0x1e0] ss:$12 sps:$4 sm:$0xff]   ;;  %v2030_v53 = vld [vmem:[#allocation8 + $0x1c8] ss:$12 sps:$4 sm:$0xff]   ;;  %v2033_v56 = vld [vmem:[#allocation8 + $0x30] ss:$12 sps:$4 sm:$0xff]  }
  0x60   :  { %v2029_v50 = vld [vmem:[#allocation8 + $0x4c] ss:$12 sps:$4 sm:$0xff]   ;;  %v2035_v54 = vld [vmem:[#allocation8 + $0x34] ss:$12 sps:$4 sm:$0xff]   ;;  %v2036_v57 = vld [vmem:[#allocation8 + $0x1b0] ss:$12 sps:$4 sm:$0xff]  }
  0x61   :  { %336 = vmatpush1.bf16.msra.mxu0 %v1983_v19  ;;  %377 = vmatpush1.bf16.msra.mxu1 %v1984_v20  ;;  %v2032_v51 = vld [vmem:[#allocation8 + $0x1cc] ss:$12 sps:$4 sm:$0xff]   ;;  %v2038_v55 = vld [vmem:[#allocation8 + $0x1b4] ss:$12 sps:$4 sm:$0xff]   ;;  %v2041_v58 = vld [vmem:[#allocation8 + $0x1c] ss:$12 sps:$4 sm:$0xff]  }
  0x62   :  { %337 = vmatprep.subr.bf16.mxu0 %v1985_v21  ;;  %378 = vmatprep.subr.bf16.mxu1 %v1987_v22  ;;  %v2044_v59 = vld [vmem:[#allocation8 + $0x19c] ss:$12 sps:$4 sm:$0xff]   ;;  %v2039_v60 = vld [vmem:[#allocation8 + $0x18] ss:$12 sps:$4 sm:$0xff]   ;;  %v2045_v0 = vld [vmem:[#allocation8] ss:$12 sps:$4 sm:$0xff]  }
  0x63   :  { %v2042_v61 = vld [vmem:[#allocation8 + $0x198] ss:$12 sps:$4 sm:$0xff]   ;;  %v2048_v1 = vld [vmem:[#allocation8 + $0x180] ss:$12 sps:$4 sm:$0xff]   ;;  %v2051_v4 = vld [vmem:[#allocation8 + $0x168] ss:$12 sps:$4 sm:$0xff]  }
  0x64   :  { %v2047_v62 = vld [vmem:[#allocation8 + $0x4] ss:$12 sps:$4 sm:$0xff]   ;;  %v2053_v2 = vld [vmem:[#allocation8 + $0x16c] ss:$12 sps:$4 sm:$0xff]   ;;  %v2054_v5 = vld [vmem:[#allocation8 + $0x2e8] ss:$12 sps:$4 sm:$0xff]  }
  0x65   :  { %338 = vmatpush1.bf16.msra.mxu0 %v1989_v23  ;;  %379 = vmatpush1.bf16.msra.mxu1 %v1990_v24  ;;  %v2050_v63 = vld [vmem:[#allocation8 + $0x184] ss:$12 sps:$4 sm:$0xff]   ;;  %v2056_v3 = vld [vmem:[#allocation8 + $0x2ec] ss:$12 sps:$4 sm:$0xff]   ;;  %v2059_v6 = vld [vmem:[#allocation8 + $0x154] ss:$12 sps:$4 sm:$0xff]  }
  0x66   :  { %339 = vmatprep.subr.bf16.mxu0 %v1991_v25  ;;  %380 = vmatprep.subr.bf16.mxu1 %v1993_v26  ;;  %v2062_v7 = vld [vmem:[#allocation8 + $0x2d4] ss:$12 sps:$4 sm:$0xff]   ;;  %v2057_v8 = vld [vmem:[#allocation8 + $0x150] ss:$12 sps:$4 sm:$0xff]   ;;  %v2063_v12 = vld [vmem:[#allocation8 + $0x138] ss:$12 sps:$4 sm:$0xff]  }
  0x67   :  { %v2060_v9 = vld [vmem:[#allocation8 + $0x2d0] ss:$12 sps:$4 sm:$0xff]   ;;  %v2066_v13 = vld [vmem:[#allocation8 + $0x2b8] ss:$12 sps:$4 sm:$0xff]   ;;  %v2069_v16 = vld [vmem:[#allocation8 + $0x120] ss:$12 sps:$4 sm:$0xff]  }
  0x68   :  { %v2065_v10 = vld [vmem:[#allocation8 + $0x13c] ss:$12 sps:$4 sm:$0xff]   ;;  %v2071_v14 = vld [vmem:[#allocation8 + $0x124] ss:$12 sps:$4 sm:$0xff]   ;;  %v2072_v17 = vld [vmem:[#allocation8 + $0x2a0] ss:$12 sps:$4 sm:$0xff]  }
  0x69   :  { %340 = vmatpush1.bf16.msra.mxu0 %v1995_v27  ;;  %381 = vmatpush1.bf16.msra.mxu1 %v1996_v28  ;;  %v2068_v11 = vld [vmem:[#allocation8 + $0x2bc] ss:$12 sps:$4 sm:$0xff]   ;;  %v2074_v15 = vld [vmem:[#allocation8 + $0x2a4] ss:$12 sps:$4 sm:$0xff]   ;;  %v2077_v18 = vld [vmem:[#allocation8 + $0x10c] ss:$12 sps:$4 sm:$0xff]  }
  0x6a   :  { %341 = vmatprep.subr.bf16.mxu0 %v1997_v29  ;;  %382 = vmatprep.subr.bf16.mxu1 %v1999_v30  ;;  %v2080_v19 = vld [vmem:[#allocation8 + $0x28c] ss:$12 sps:$4 sm:$0xff]   ;;  %v2075_v20 = vld [vmem:[#allocation8 + $0x108] ss:$12 sps:$4 sm:$0xff]   ;;  %v2081_v24 = vld [vmem:[#allocation8 + $0xf0] ss:$12 sps:$4 sm:$0xff]  }
  0x6b   :  { %v2078_v21 = vld [vmem:[#allocation8 + $0x288] ss:$12 sps:$4 sm:$0xff]   ;;  %v2084_v25 = vld [vmem:[#allocation8 + $0x270] ss:$12 sps:$4 sm:$0xff]   ;;  %v2087_v28 = vld [vmem:[#allocation8 + $0xd8] ss:$12 sps:$4 sm:$0xff]  }
  0x6c   :  { %v2083_v22 = vld [vmem:[#allocation8 + $0xf4] ss:$12 sps:$4 sm:$0xff]   ;;  %v2089_v26 = vld [vmem:[#allocation8 + $0xdc] ss:$12 sps:$4 sm:$0xff]   ;;  %v2090_v29 = vld [vmem:[#allocation8 + $0x258] ss:$12 sps:$4 sm:$0xff]  }
  0x6d   :  { %342 = vmatpush1.bf16.msra.mxu0 %v2001_v31  ;;  %383 = vmatpush1.bf16.msra.mxu1 %v2002_v32  ;;  %v2086_v23 = vld [vmem:[#allocation8 + $0x274] ss:$12 sps:$4 sm:$0xff]   ;;  %v2092_v27 = vld [vmem:[#allocation8 + $0x25c] ss:$12 sps:$4 sm:$0xff]   ;;  %v2095_v30 = vld [vmem:[#allocation8 + $0xc4] ss:$12 sps:$4 sm:$0xff]  }
  0x6e   :  { %1074 = vmatprep.subr.bf16.mxu0 %v2005_v33  ;;  %1115 = vmatprep.subr.bf16.mxu1 %v2008_v34  ;;  %v2098_v31 = vld [vmem:[#allocation8 + $0x244] ss:$12 sps:$4 sm:$0xff]   ;;  %v2093_v32 = vld [vmem:[#allocation8 + $0xc0] ss:$12 sps:$4 sm:$0xff]   ;;  %s2344_s23 = smov [#allocation13]  }
  0x6f   :  { %v2096_v33 = vld [vmem:[#allocation8 + $0x240] ss:$12 sps:$4 sm:$0xff]   ;;  %v2099_v34 = vld [vmem:[#allocation8 + $0x170] ss:$12 sps:$4 sm:$0xff]   ;;  %s1641_s24 = sshll.u32 %s2344_s23, 4  ;;  %s1642_s24 = int_to_ptr.vmem [resolvable:$true] %s1641_s24 }
  0x70   :  { %360 = vmatmul.mubr.bf16.vlgmr.msra.gmra.mxu0 %v112_v35  ;;  %401 = vmatmul.mubr.bf16.vlgmr.msra.gmra.mxu1 %v112_v35  ;;  %v2100_v35 = vld [vmem:[#allocation8 + $0x2f0] ss:$12 sps:$4 sm:$0xff]   ;;  %p2304_p3 = scmp.lt.s32.totalorder %s1642_s24, %s1642_s24 }
  0x71   :  { %1075 = vmatpush1.bf16.msra.mxu0 %v2003_v36  ;;  %1116 = vmatpush1.bf16.msra.mxu1 %v2006_v37  ;;  %v147_v36 = vlaneseq }
  0x72   :  { %1076 = vmatprep.subr.bf16.mxu0 %v2011_v38  ;;  %1117 = vmatprep.subr.bf16.mxu1 %v2014_v39 }
  0x73   :  { %v2413_v37 = vshrl.u32 %v147_v36, 7  ;;  %v2134_v36 = vld [vmem:[#allocation10 + $0x30] sm:$0xff]  }
  0x75   :  { %1077 = vmatpush1.bf16.msra.mxu0 %v2009_v40  ;;  %1118 = vmatpush1.bf16.msra.mxu1 %v2012_v41  ;;  %v149_v38 = vsub.s32 0, %v2413_v37  ;;  %v157_v39 = vsub.s32 2, %v2413_v37  ;;  %v145_v40 = vld [vmem:[#allocation7] sm:$0xf]  ;;  %v153_v41 = vsub.s32 1, %v2413_v37 }
  0x76   :  { %1078 = vmatprep.subr.bf16.mxu0 %v2017_v42  ;;  %1119 = vmatprep.subr.bf16.mxu1 %v2020_v43  ;;  %v161_v42 = vsub.s32 3, %v2413_v37  ;;  %v2157_v37 = vld [vmem:[#allocation11 + $0x28] sm:$0xff]  }
  0x77   :  { %v150_v43 = vrot.slane %v145_v40, %v149_v38 }
  0x79   :  { %1079 = vmatpush1.bf16.msra.mxu0 %v2015_v44  ;;  %1120 = vmatpush1.bf16.msra.mxu1 %v2018_v45  ;;  %v158_v44 = vrot.slane %v145_v40, %v157_v39  ;;  %v154_v45 = vrot.slane %v145_v40, %v153_v41 }
  0x7a   :  { %1080 = vmatprep.subr.bf16.mxu0 %v2023_v46  ;;  %1121 = vmatprep.subr.bf16.mxu1 %v2026_v47  ;;  %v162_v46 = vrot.slane %v145_v40, %v161_v42  ;;  %v2135_v40 = vld [vmem:[#allocation10 + $0x68] sm:$0xff]  }
  0x7b   :  { %v2136_v42 = vld [vmem:[#allocation10 + $0x28] sm:$0xff]  }
  0x7d   :  { %1081 = vmatpush1.bf16.msra.mxu0 %v2021_v48  ;;  %1122 = vmatpush1.bf16.msra.mxu1 %v2024_v49 }
  0x7e   :  { %1082 = vmatprep.subr.bf16.mxu0 %v2029_v50  ;;  %1123 = vmatprep.subr.bf16.mxu1 %v2032_v51 }
  0x81   :  { %1083 = vmatpush1.bf16.msra.mxu0 %v2027_v52  ;;  %1124 = vmatpush1.bf16.msra.mxu1 %v2030_v53 }
  0x82   :  { %1084 = vmatprep.subr.bf16.mxu0 %v2035_v54  ;;  %1125 = vmatprep.subr.bf16.mxu1 %v2038_v55 }
  0x85   :  { %1085 = vmatpush1.bf16.msra.mxu0 %v2033_v56  ;;  %1126 = vmatpush1.bf16.msra.mxu1 %v2036_v57 }
  0x86   :  { %1086 = vmatprep.subr.bf16.mxu0 %v2041_v58  ;;  %1127 = vmatprep.subr.bf16.mxu1 %v2044_v59 }
  0x89   :  { %1087 = vmatpush1.bf16.msra.mxu0 %v2039_v60  ;;  %1128 = vmatpush1.bf16.msra.mxu1 %v2042_v61 }
  0x8a   :  { %1088 = vmatprep.subr.bf16.mxu0 %v2047_v62  ;;  %1129 = vmatprep.subr.bf16.mxu1 %v2050_v63 }
  0x8d   :  { %1089 = vmatpush1.bf16.msra.mxu0 %v2045_v0  ;;  %1130 = vmatpush1.bf16.msra.mxu1 %v2048_v1  ;;  %v2101_v1 = vld [vmem:[#allocation8 + $0xb0] ss:$12 sps:$4 sm:$0xff]  }
  0x8e   :  { %1090 = vmatprep.subr.bf16.mxu0 %v2053_v2  ;;  %1131 = vmatprep.subr.bf16.mxu1 %v2056_v3 }
  0x91   :  { %1091 = vmatpush2.bf16.msra.mxu0 %v2051_v4  ;;  %1132 = vmatpush2.bf16.msra.mxu1 %v2054_v5  ;;  %v2102_v4 = vld [vmem:[#allocation8 + $0x230] ss:$12 sps:$4 sm:$0xff]   ;;  %v2103_v5 = vld [vmem:[#allocation8 + $0x158] ss:$12 sps:$4 sm:$0xff]  }
  0x92   :  { %1092 = vmatprep.subr.bf16.mxu0 %v2059_v6  ;;  %1133 = vmatprep.subr.bf16.mxu1 %v2062_v7  ;;  %v2104_v6 = vld [vmem:[#allocation8 + $0x2d8] ss:$12 sps:$4 sm:$0xff]  }
  0x93   :  { %v2105_v7 = vld [vmem:[#allocation8 + $0x98] ss:$12 sps:$4 sm:$0xff]  }
  0x95   :  { %1093 = vmatpush2.bf16.msra.mxu0 %v2057_v8  ;;  %1134 = vmatpush2.bf16.msra.mxu1 %v2060_v9  ;;  %v2106_v8 = vld [vmem:[#allocation8 + $0x218] ss:$12 sps:$4 sm:$0xff]   ;;  %v2107_v9 = vld [vmem:[#allocation8 + $0x140] ss:$12 sps:$4 sm:$0xff]  }
  0x96   :  { %1094 = vmatprep.subr.bf16.mxu0 %v2065_v10  ;;  %1135 = vmatprep.subr.bf16.mxu1 %v2068_v11  ;;  %v2108_v10 = vld [vmem:[#allocation8 + $0x2c0] ss:$12 sps:$4 sm:$0xff]  }
  0x97   :  { %v2109_v11 = vld [vmem:[#allocation8 + $0x80] ss:$12 sps:$4 sm:$0xff]  }
  0x99   :  { %1095 = vmatpush2.bf16.msra.mxu0 %v2063_v12  ;;  %1136 = vmatpush2.bf16.msra.mxu1 %v2066_v13  ;;  %v2110_v12 = vld [vmem:[#allocation8 + $0x200] ss:$12 sps:$4 sm:$0xff]   ;;  %v2111_v13 = vld [vmem:[#allocation8 + $0x128] ss:$12 sps:$4 sm:$0xff]  }
  0x9a   :  { %1096 = vmatprep.subr.bf16.mxu0 %v2071_v14  ;;  %1137 = vmatprep.subr.bf16.mxu1 %v2074_v15  ;;  %v2112_v14 = vld [vmem:[#allocation8 + $0x2a8] ss:$12 sps:$4 sm:$0xff]  }
  0x9b   :  { %v2113_v15 = vld [vmem:[#allocation8 + $0x68] ss:$12 sps:$4 sm:$0xff]  }
  0x9d   :  { %1097 = vmatpush2.bf16.msra.mxu0 %v2069_v16  ;;  %1138 = vmatpush2.bf16.msra.mxu1 %v2072_v17  ;;  %v2114_v16 = vld [vmem:[#allocation8 + $0x1e8] ss:$12 sps:$4 sm:$0xff]   ;;  %v2115_v17 = vld [vmem:[#allocation8 + $0x110] ss:$12 sps:$4 sm:$0xff]  }
  0x9e   :  { %1098 = vmatprep.subr.bf16.mxu0 %v2077_v18  ;;  %1139 = vmatprep.subr.bf16.mxu1 %v2080_v19  ;;  %v2116_v18 = vld [vmem:[#allocation8 + $0x290] ss:$12 sps:$4 sm:$0xff]  }
  0x9f   :  { %v2117_v19 = vld [vmem:[#allocation8 + $0x50] ss:$12 sps:$4 sm:$0xff]  }
  0xa1   :  { %1099 = vmatpush2.bf16.msra.mxu0 %v2075_v20  ;;  %1140 = vmatpush2.bf16.msra.mxu1 %v2078_v21  ;;  %v2118_v20 = vld [vmem:[#allocation8 + $0x1d0] ss:$12 sps:$4 sm:$0xff]   ;;  %v2119_v21 = vld [vmem:[#allocation8 + $0xf8] ss:$12 sps:$4 sm:$0xff]  }
  0xa2   :  { %1100 = vmatprep.subr.bf16.mxu0 %v2083_v22  ;;  %1141 = vmatprep.subr.bf16.mxu1 %v2086_v23  ;;  %v2120_v22 = vld [vmem:[#allocation8 + $0x278] ss:$12 sps:$4 sm:$0xff]  }
  0xa3   :  { %v2121_v23 = vld [vmem:[#allocation8 + $0x38] ss:$12 sps:$4 sm:$0xff]  }
  0xa5   :  { %1101 = vmatpush2.bf16.msra.mxu0 %v2081_v24  ;;  %1142 = vmatpush2.bf16.msra.mxu1 %v2084_v25  ;;  %v2122_v24 = vld [vmem:[#allocation8 + $0x1b8] ss:$12 sps:$4 sm:$0xff]   ;;  %v2123_v25 = vld [vmem:[#allocation8 + $0xe0] ss:$12 sps:$4 sm:$0xff]  }
  0xa6   :  { %1102 = vmatprep.subr.bf16.mxu0 %v2089_v26  ;;  %1143 = vmatprep.subr.bf16.mxu1 %v2092_v27  ;;  %v2124_v26 = vld [vmem:[#allocation8 + $0x260] ss:$12 sps:$4 sm:$0xff]  }
  0xa7   :  { %v2125_v27 = vld [vmem:[#allocation8 + $0x20] ss:$12 sps:$4 sm:$0xff]  }
  0xa9   :  { %1103 = vmatpush2.bf16.msra.mxu0 %v2087_v28  ;;  %1144 = vmatpush2.bf16.msra.mxu1 %v2090_v29  ;;  %v2126_v28 = vld [vmem:[#allocation8 + $0x1a0] ss:$12 sps:$4 sm:$0xff]   ;;  %v2127_v29 = vld [vmem:[#allocation8 + $0xc8] ss:$12 sps:$4 sm:$0xff]  }
  0xaa   :  { %1104 = vmatprep.subr.bf16.mxu0 %v2095_v30  ;;  %1145 = vmatprep.subr.bf16.mxu1 %v2098_v31  ;;  %v2128_v30 = vld [vmem:[#allocation8 + $0x248] ss:$12 sps:$4 sm:$0xff]  }
  0xab   :  { %v2129_v31 = vld [vmem:[#allocation8 + $0x8] ss:$12 sps:$4 sm:$0xff]  }
  0xad   :  { %1105 = vmatpush2.bf16.msra.mxu0 %v2093_v32  ;;  %1146 = vmatpush2.bf16.msra.mxu1 %v2096_v33  ;;  %v2130_v32 = vld [vmem:[#allocation8 + $0x188] ss:$12 sps:$4 sm:$0xff]   ;;  %v2131_v33 = vld [vmem:[#allocation10 + $0x78] sm:$0xff]  }
  0xae   :  { %1815 = vmatprep.subr.bf16.mxu0 %v2099_v34  ;;  %1837 = vmatprep.subr.bf16.mxu1 %v2100_v35  ;;  %v2132_v34 = vld [vmem:[#allocation10 + $0x38] sm:$0xff]   ;;  %v2133_v35 = vld [vmem:[#allocation10 + $0x70] sm:$0xff]  }
 0x130   :  { %v361_v47 = vpop.f32.mrf.mxu0  ;;  %v402_v48 = vpop.f32.mrf.mxu1 }
 0x131   :  { %v362_v49 = vadd.f32 %v361_v47, %v150_v43  ;;  %v403_v50 = vadd.f32 %v402_v48, %v158_v44  ;;  %v2137_v43 = vld [vmem:[#allocation10 + $0x60] sm:$0xff]   ;;  %v2141_v47 = vld [vmem:[#allocation10 + $0x50] sm:$0xff]  }
 0x132   :  { %v363_v51 = vpop.f32.mrf.mxu0  ;;  %v404_v52 = vpop.f32.mrf.mxu1  ;;  %v2138_v44 = vld [vmem:[#allocation10 + $0x20] sm:$0xff]   ;;  %v2142_v48 = vld [vmem:[#allocation10 + $0x10] sm:$0xff]  }
 0x133   :  { %2163 = vtanh.f32 %v362_v49  ;;  %v364_v53 = vadd.f32 %v363_v51, %v154_v45  ;;  %v405_v54 = vadd.f32 %v404_v52, %v162_v46  ;;  %v2139_v45 = vld [vmem:[#allocation10 + $0x58] sm:$0xff]   ;;  %v2143_v49 = vld [vmem:[#allocation10 + $0x48] sm:$0xff]   ;;  %v2145_v51 = vld [vmem:[#allocation10 + $0x40] sm:$0xff]  }
 0x134   :  { %2165 = vtanh.f32 %v403_v50  ;;  %v365_v55 = vpop.f32.mrf.mxu0  ;;  %v406_v56 = vpop.f32.mrf.mxu1  ;;  %v2140_v46 = vld [vmem:[#allocation10 + $0x18] sm:$0xff]   ;;  %v2144_v50 = vld [vmem:[#allocation10 + $0x8] sm:$0xff]   ;;  %v2146_v52 = vld [vmem:[#allocation10] sm:$0xff]  }
 0x135   :  { %2167 = vtanh.f32 %v364_v53  ;;  %v2147_v53 = vld [vmem:[#allocation10 + $0xb8] sm:$0xff]   ;;  %v2148_v55 = vld [vmem:[#allocation10 + $0xb0] sm:$0xff]   ;;  %v2149_v56 = vld [vmem:[#allocation10 + $0xa8] sm:$0xff]  }
 0x136   :  { %2169 = vtanh.f32 %v405_v54  ;;  %v366_v57 = vpop.f32.mrf.mxu0  ;;  %v407_v58 = vpop.f32.mrf.mxu1  ;;  %v2342_v54 = vmov 0.0  }
 0x137   :  { %v2150_v57 = vld [vmem:[#allocation10 + $0xa0] sm:$0xff]   ;;  %v2151_v58 = vld [vmem:[#allocation10 + $0x98] sm:$0xff]  }
 0x140   :  { %v2164_v59 = vpop.eup %2163 }
 0x141   :  { %v2166_v60 = vpop.eup %2165  ;;  %v2427_v2 = vpack.c.bf16 %v2164_v59, %v2164_v59  ;;  %v2152_v59 = vld [vmem:[#allocation10 + $0x90] sm:$0xff]  }
 0x142   :  { %v2168_v61 = vpop.eup %2167  ;;  %v2425_v63 = vpack.c.bf16 %v2166_v60, %v2166_v60  ;;  %v2153_v60 = vld [vmem:[#allocation10 + $0x88] sm:$0xff]  }
 0x143   :  { %v2170_v62 = vpop.eup %2169  ;;  %v414_v0 = vpack.c.bf16 %v2168_v61, %v2168_v61  ;;  %v2154_v61 = vld [vmem:[#allocation10 + $0x80] sm:$0xff]  }
 0x144   :  { %v416_v3 = vpack.c.bf16 %v2170_v62, %v2170_v62  ;;  %v545_v62 = vld [vmem:[%s2475_s4] sm:$0x7] }
 0x145   :  { %1106 = vmatprep.mubr.bf16.mxu0 %v414_v0 }
 0x146   :  { %1147 = vmatprep.mubr.bf16.mxu1 %v416_v3  ;;  %1107 = vmatmul.mubr.bf16.vlgmr.msra.gmra.mxu0 %v2427_v2 }
 0x147   :  { %1148 = vmatmul.mubr.bf16.vlgmr.msra.gmra.mxu1 %v2425_v63  ;;  %1816 = vmatpush3.bf16.msra.mxu0 %v2101_v1 }
 0x148   :  { %1838 = vmatpush3.bf16.msra.mxu1 %v2102_v4  ;;  %1188 = vmatprep.mubr.bf16.mxu0 %v414_v0  ;;  %v554_v0 = vrot.slane %v545_v62, %v153_v41 }
 0x149   :  { %1228 = vmatprep.mubr.bf16.mxu1 %v416_v3  ;;  %1817 = vmatprep.subr.bf16.mxu0 %v2103_v5 }
 0x14a   :  { %1839 = vmatprep.subr.bf16.mxu1 %v2104_v6 }
 0x14b   :  { %1818 = vmatpush3.bf16.msra.mxu0 %v2105_v7 }
 0x14c   :  { %1840 = vmatpush3.bf16.msra.mxu1 %v2106_v8  ;;  %1819 = vmatprep.subr.bf16.mxu0 %v2107_v9 }
 0x14d   :  { %1841 = vmatprep.subr.bf16.mxu1 %v2108_v10 }
 0x14f   :  { %1820 = vmatpush3.bf16.msra.mxu0 %v2109_v11 }
 0x150   :  { %1842 = vmatpush3.bf16.msra.mxu1 %v2110_v12  ;;  %1821 = vmatprep.subr.bf16.mxu0 %v2111_v13 }
 0x151   :  { %1843 = vmatprep.subr.bf16.mxu1 %v2112_v14 }
 0x153   :  { %1822 = vmatpush3.bf16.msra.mxu0 %v2113_v15 }
 0x154   :  { %1844 = vmatpush3.bf16.msra.mxu1 %v2114_v16  ;;  %1823 = vmatprep.subr.bf16.mxu0 %v2115_v17  ;;  %v558_v17 = vrot.slane %v545_v62, %v157_v39  ;;  %v2158_v39 = vld [vmem:[#allocation11 + $0x20] sm:$0xff]  }
 0x155   :  { %1845 = vmatprep.subr.bf16.mxu1 %v2116_v18 }
 0x157   :  { %1824 = vmatpush3.bf16.msra.mxu0 %v2117_v19 }
 0x158   :  { %1846 = vmatpush3.bf16.msra.mxu1 %v2118_v20  ;;  %1825 = vmatprep.subr.bf16.mxu0 %v2119_v21 }
 0x159   :  { %1847 = vmatprep.subr.bf16.mxu1 %v2120_v22 }
 0x15b   :  { %1826 = vmatpush3.bf16.msra.mxu0 %v2121_v23 }
 0x15c   :  { %1848 = vmatpush3.bf16.msra.mxu1 %v2122_v24  ;;  %1827 = vmatprep.subr.bf16.mxu0 %v2123_v25 }
 0x15d   :  { %1849 = vmatprep.subr.bf16.mxu1 %v2124_v26 }
 0x15f   :  { %1828 = vmatpush3.bf16.msra.mxu0 %v2125_v27 }
 0x160   :  { %1850 = vmatpush3.bf16.msra.mxu1 %v2126_v28  ;;  %1829 = vmatprep.subr.bf16.mxu0 %v2127_v29 }
 0x161   :  { %1851 = vmatprep.subr.bf16.mxu1 %v2128_v30  ;;  %v2155_v30 = vld [vmem:[#allocation11 + $0x38] sm:$0xff]  }
 0x163   :  { %1830 = vmatpush3.bf16.msra.mxu0 %v2129_v31  ;;  %v2156_v31 = vld [vmem:[#allocation11 + $0x30] sm:$0xff]  }
 0x164   :  { %1852 = vmatpush3.bf16.msra.mxu1 %v2130_v32  ;;  %1859 = vmatprep.subr.bf16.mxu0 %v2131_v33  ;;  %v2159_v32 = vld [vmem:[#allocation11 + $0x18] sm:$0xff]   ;;  %v2160_v33 = vld [vmem:[#allocation11 + $0x10] sm:$0xff]  }
 0x165   :  { %1899 = vmatprep.subr.bf16.mxu1 %v2342_v54 }
 0x166   :  { %1189 = vmatmul.mubr.bf16.vlgmr.msra.gmra.mxu0 %v2427_v2 }
 0x167   :  { %1229 = vmatmul.mubr.bf16.vlgmr.msra.gmra.mxu1 %v2425_v63  ;;  %1860 = vmatpush3.bf16.msra.mxu0 %v2132_v34  ;;  %v550_v63 = vrot.slane %v545_v62, %v149_v38  ;;  %v2161_v34 = vld [vmem:[#allocation11 + $0x8] sm:$0xff]  }
 0x168   :  { %1861 = vmatprep.subr.bf16.mxu0 %v2133_v35  ;;  %1900 = vmatpush3.bf16.msra.mxu1 %v2147_v53  ;;  %v2162_v35 = vld [vmem:[#allocation11] sm:$0xff]  }
 0x169   :  { %1901 = vmatprep.subr.bf16.mxu1 %v2342_v54  ;;  %1915 = vmatprep.mubr.msk.bf16.mxu1 %vm2343_vm0, %v2342_v54 }
 0x16b   :  { %1862 = vmatpush3.bf16.msra.mxu0 %v2134_v36 }
 0x16c   :  { %1863 = vmatprep.subr.bf16.mxu0 %v2135_v40  ;;  %1902 = vmatpush3.bf16.msra.mxu1 %v2148_v55 }
 0x16d   :  { %1903 = vmatprep.subr.bf16.mxu1 %v2342_v54 }
 0x16f   :  { %1864 = vmatpush3.bf16.msra.mxu0 %v2136_v42 }
 0x170   :  { %1865 = vmatprep.subr.bf16.mxu0 %v2137_v43  ;;  %1904 = vmatpush3.bf16.msra.mxu1 %v2149_v56 }
 0x171   :  { %1905 = vmatprep.subr.bf16.mxu1 %v2342_v54 }
 0x173   :  { %1866 = vmatpush3.bf16.msra.mxu0 %v2138_v44 }
 0x174   :  { %1867 = vmatprep.subr.bf16.mxu0 %v2139_v45  ;;  %1906 = vmatpush3.bf16.msra.mxu1 %v2150_v57  ;;  %v1781_v45 = vld [vmem:[%s2477_s6] ss:$0 sm:$0xff]  ;;  %s2299_s6 = scalar_lea.vmem %s1642_s24, 128 }
 0x175   :  { %1907 = vmatprep.subr.bf16.mxu1 %v2342_v54  ;;  %p2300_p2 = scmp.ne.s32.totalorder %s1642_s24, %s2299_s6  ;;  %p2305_p4 = scmp.lt.s32.totalorder %s2299_s6, %s2299_s6 }
 0x177   :  { %1868 = vmatpush3.bf16.msra.mxu0 %v2140_v46  ;;  %p2306_p5 = por %p2305_p4, %p2304_p3 }
 0x178   :  { %1869 = vmatprep.subr.bf16.mxu0 %v2141_v47  ;;  %1908 = vmatpush3.bf16.msra.mxu1 %v2151_v58 }
 0x179   :  { %1909 = vmatprep.subr.bf16.mxu1 %v2342_v54  ;;  %p2307_p6 = pnand %p2306_p5, %p2300_p2 }
 0x17b   :  { %1870 = vmatpush3.bf16.msra.mxu0 %v2142_v48 }
 0x17c   :  { %1871 = vmatprep.subr.bf16.mxu0 %v2143_v49  ;;  %1910 = vmatpush3.bf16.msra.mxu1 %v2152_v59 }
 0x17d   :  { %1911 = vmatprep.subr.bf16.mxu1 %v2342_v54 }
 0x17f   :  { %1872 = vmatpush3.bf16.msra.mxu0 %v2144_v50 }
 0x180   :  { %1873 = vmatprep.subr.bf16.mxu0 %v2145_v51  ;;  %1912 = vmatpush3.bf16.msra.mxu1 %v2153_v60 }
 0x181   :  { %1913 = vmatprep.subr.bf16.mxu1 %v2342_v54 }
 0x183   :  { %1874 = vmatpush3.bf16.msra.mxu0 %v2146_v52 }
 0x184   :  { %1919 = vmatprep.subr.bf16.mxu0 %v2342_v54  ;;  %1914 = vmatpush3.bf16.msra.mxu1 %v2154_v61 }
 0x206   :  { %v1108_v1 = vpop.f32.mrf.mxu0 }
 0x207   :  { %v1109_v2 = vadd.f32 %v1108_v1, %v550_v63  ;;  %v1149_v3 = vpop.f32.mrf.mxu1 }
 0x208   :  { %v1110_v4 = vpop.f32.mrf.mxu0 }
 0x209   :  { %v1150_v5 = vadd.f32 %v1149_v3, %v1109_v2  ;;  %v1111_v6 = vadd.f32 %v1110_v4, %v554_v0  ;;  %v1151_v7 = vpop.f32.mrf.mxu1 }
 0x20a   :  { %v1112_v8 = vpop.f32.mrf.mxu0 }
 0x20b   :  { %v1152_v9 = vadd.f32 %v1151_v7, %v1111_v6  ;;  %v1153_v10 = vpop.f32.mrf.mxu1  ;;  %2171 = vtanh.f32 %v1150_v5 }
 0x20c   :  { %v1113_v11 = vpop.f32.mrf.mxu0 }
 0x20d   :  { %2173 = vtanh.f32 %v1152_v9  ;;  %v1154_v12 = vpop.f32.mrf.mxu1 }
 0x218   :  { %v2172_v13 = vpop.eup %2171 }
 0x219   :  { %v1239_v15 = vpack.c.bf16 %v2172_v13, %v2172_v13 }
 0x21a   :  { %v2174_v14 = vpop.eup %2173 }
 0x21b   :  { %v1240_v38 = vpack.c.bf16 %v2174_v14, %v2174_v14 }
 0x21d   :  { %1473 = vmatprep.mubr.bf16.mxu0 %v1240_v38 }
 0x21e   :  { %1474 = vmatmul.mubr.bf16.vlgmr.msra.gmra.mxu0 %v1239_v15 }
 0x21f   :  { %1935 = vmatprep.mubr.msk.bf16.mxu0 %vm2343_vm0, %v2342_v54  ;;  %1920 = vmatpush3.bf16.msra.mxu0 %v2155_v30 }
 0x220   :  { %1921 = vmatprep.subr.bf16.mxu0 %v2342_v54 }
 0x223   :  { %1922 = vmatpush3.bf16.msra.mxu0 %v2156_v31 }
 0x224   :  { %1923 = vmatprep.subr.bf16.mxu0 %v2342_v54 }
 0x226   :  { %v1831_v41 = vpop.f32.mrf.mxu0 }
 0x227   :  { %v1853_v16 = vpop.f32.mrf.mxu1  ;;  %1924 = vmatpush3.bf16.msra.mxu0 %v2157_v37 }
 0x228   :  { %v1832_v18 = vpop.f32.mrf.mxu0  ;;  %1925 = vmatprep.subr.bf16.mxu0 %v2342_v54 }
 0x229   :  { %v1833_v19 = vadd.f32 %v1832_v18, %v1831_v41  ;;  %v1854_v20 = vpop.f32.mrf.mxu1 }
 0x22a   :  { %v1834_v21 = vpop.f32.mrf.mxu0  ;;  %v1855_v23 = vadd.f32 %v1854_v20, %v1853_v16 }
 0x22b   :  { %v1191_v22 = vadd.f32 %v1833_v19, %v558_v17  ;;  %v1856_v24 = vpop.f32.mrf.mxu1  ;;  %1926 = vmatpush3.bf16.msra.mxu0 %v2158_v39 }
 0x22c   :  { %v1835_v25 = vpop.f32.mrf.mxu0  ;;  %1927 = vmatprep.subr.bf16.mxu0 %v2342_v54 }
 0x22d   :  { %v1231_v26 = vadd.f32 %v1855_v23, %v1191_v22  ;;  %v1857_v27 = vpop.f32.mrf.mxu1 }
 0x22f   :  { %2175 = vtanh.f32 %v1231_v26  ;;  %1928 = vmatpush3.bf16.msra.mxu0 %v2159_v32 }
 0x230   :  { %1929 = vmatprep.subr.bf16.mxu0 %v2342_v54 }
 0x233   :  { %1930 = vmatpush3.bf16.msra.mxu0 %v2160_v33 }
 0x234   :  { %1931 = vmatprep.subr.bf16.mxu0 %v2342_v54 }
 0x237   :  { %1932 = vmatpush3.bf16.msra.mxu0 %v2161_v34 }
 0x238   :  { %1933 = vmatprep.subr.bf16.mxu0 %v2342_v54  ;;  %v1806_v54 = vld [vmem:[%s2479_s8] ss:$0 sm:$0xff] }
 0x23b   :  { %1934 = vmatpush3.bf16.msra.mxu0 %v2162_v35 }
 0x23c   :  { %v2176_v28 = vpop.eup %2175 }
 0x23d   :  { %v1241_v29 = vpack.c.bf16 %v2176_v28, %v2176_v28 }
 0x23f   :  { %1916 = vmatmul.mubr.bf16.vlgmr.msra.gmra.mxu1 %v1241_v29 }
 0x2de   :  { %v1875_v36 = vpop.f32.mrf.mxu0 }
 0x2e0   :  { %v1876_v40 = vpop.f32.mrf.mxu0 }
 0x2e1   :  { %v1877_v44 = vadd.f32 %v1876_v40, %v1875_v36 }
 0x2e2   :  { %v1878_v42 = vpop.f32.mrf.mxu0 }
 0x2e3   :  { %v1476_v46 = vadd.f32 %v1877_v44, %v1781_v45 }
 0x2e4   :  { %v1879_v43 = vpop.f32.mrf.mxu0 }
 0x2ff   :  { %v1515_v47 = vpop.f32.mrf.mxu1 }
 0x300   :  { %v1516_v48 = vadd.f32 %v1515_v47, %v1476_v46 }
 0x301   :  { %v1917_v49 = vpop.f32.mrf.mxu1 }
 0x302   :  { %2177 = vtanh.f32 %v1516_v48 }
 0x303   :  { %v1518_v50 = vpop.f32.mrf.mxu1 }
 0x305   :  { %v1918_v51 = vpop.f32.mrf.mxu1 }
 0x30f   :  { %v2178_v52 = vpop.eup %2177 }
 0x310   :  { %v1522_v53 = vpack.c.bf16 %v2178_v52, %v2178_v52 }
 0x312   :  { %1936 = vmatmul.mubr.bf16.vlgmr.msra.gmra.mxu0 %v1522_v53 }
 0x3d2   :  { %v1628_v55 = vpop.f32.mrf.mxu0 }
 0x3d3   :  { %v1629_v56 = vadd.f32 %v1806_v54, %v1628_v55 }
 0x3d4   :  { %v1937_v57 = vpop.f32.mrf.mxu0 }
 0x3d5   :  { %1634 = vst [vmem:[#allocation13] sm:$0xff] %v1629_v56 }
 0x3d6   :  { %v1631_v58 = vpop.f32.mrf.mxu0 }
 0x3d7   :  { %2310 = shalt.err (!%p2307_p6)
}
 0x3d8   :  { %1644 = dma.vmem_to_hbm [thread:$0]  %s1642_s24, 128, %s2480_s9, [#allocation4]   ;;  %v1938_v59 = vpop.f32.mrf.mxu0 }
 0x3d9   :  { %2327 = dma.done.wait [#allocation4], 128  }
 0x3da   :  { %2328 = vsyncadd [#allocation4], 4294967168 }
 0x3db   :  { %1648 = vsyncpa [#allocation3], 1 }
 0x3dc   :  { %1649 = vsyncpa [#allocation6], 1 }
 0x3dd   :  { %1650 = vsyncpa [#allocation9], 1 }
 0x3de   :  { %1651 = vsyncpa [#allocation12], 1 }
 0x3df   :  { %1652 = vsyncpa [#allocation4], 1 }

</bundles_post_ra>
